<compile_context>
chip_gen: v6e
topology: v6e:2x2x1
jax: 0.10.0
libtpu: 0.0.40
codegen_flags: <defaults>
</compile_context>

<pallas_src>
import functools

import jax
import jax.numpy as jnp
from jax.experimental import pallas as pl
from jax.experimental.pallas import tpu as pltpu

EPS = 1e-5            # nn.BatchNorm2d default eps
NEG_SLOPE = 0.01      # nn.LeakyReLU default negative_slope
LANES = 128
DEFAULT_BLOCK_ROWS = 512   # M-tile; re-derived smaller automatically for tiny M

_CPARAMS = pltpu.CompilerParams(
    dimension_semantics=("parallel",),        # M tiles are independent -> megacore OK
    vmem_limit_bytes=32 * 1024 * 1024,        # safe on v5e/v6e (128 MiB) and v7x (64 MiB)
)


def _round_up(x, m):
    return (x + m - 1) // m * m


# ---------------------------------------------------------------------------
# Pass 1: tiled bf16 matmul + per-tile partial BN statistics (f32)
# ---------------------------------------------------------------------------
def _matmul_stats_kernel(p_ref, w_ref, y_ref, stats_ref, *, block_rows, m_real):
    i = pl.program_id(0)
    # (TM, K) bf16 @ (K, Cpad) bf16 -> f32 accumulation on the MXU.
    y = jnp.dot(p_ref[...], w_ref[...], preferred_element_type=jnp.float32)
    y_ref[...] = y

    # Mask rows past the real M (zero-padded patch rows) out of the statistics.
    rows = i * block_rows + jax.lax.broadcasted_iota(jnp.int32, (block_rows, 1), 0)
    ym = jnp.where(rows < m_real, y, 0.0)
    s = jnp.sum(ym, axis=0, keepdims=True)            # (1, Cpad)
    ss = jnp.sum(ym * ym, axis=0, keepdims=True)      # (1, Cpad)
    pad = jnp.zeros((6, y.shape[1]), jnp.float32)
    stats_ref[...] = jnp.concatenate([s, ss, pad], axis=0)   # (8, Cpad) tile


# ---------------------------------------------------------------------------
# Pass 2: fused per-channel scale/shift (folded BN) + LeakyReLU
# ---------------------------------------------------------------------------
def _scale_shift_lrelu_kernel(y_ref, s_ref, t_ref, o_ref):
    z = y_ref[...] * s_ref[...] + t_ref[...]
    o_ref[...] = jnp.where(z >= 0, z, NEG_SLOPE * z)


# ---------------------------------------------------------------------------
# Glue: im2col patch extraction (bf16), one conv+BN+LeakyReLU stage
# ---------------------------------------------------------------------------
def _extract_patches_nhwc(x, k, stride, pad):
    """im2col: (N,H,W,C) -> ((N*Ho*Wo, k*k*C), Ho, Wo); flat order (ky, kx, ci)."""
    if pad:
        x = jnp.pad(x, ((0, 0), (pad, pad), (pad, pad), (0, 0)))
    N, H, W, C = x.shape
    Ho = (H - k) // stride + 1
    Wo = (W - k) // stride + 1
    cols = []
    for ky in range(k):
        for kx in range(k):
            cols.append(
                x[:, ky:ky + stride * (Ho - 1) + 1:stride,
                     kx:kx + stride * (Wo - 1) + 1:stride, :]
            )
    patches = jnp.concatenate(cols, axis=-1)          # (N, Ho, Wo, k*k*C)
    return patches.reshape(N * Ho * Wo, k * k * C), Ho, Wo


def _conv_bn_lrelu_stage(x_nhwc, wmat, gamma_pad, beta_pad, *, cout, k, stride, pad,
                         block_rows=DEFAULT_BLOCK_ROWS):
    """One Conv2d(k,stride,pad) + train-mode BatchNorm + LeakyReLU stage."""
    N = x_nhwc.shape[0]
    patches, ho, wo = _extract_patches_nhwc(x_nhwc.astype(jnp.bfloat16), k, stride, pad)
    m_real, kdim = patches.shape
    cpad = wmat.shape[1]

    tm = min(block_rows, _round_up(m_real, 8))
    m_pad = _round_up(m_real, tm)
    num_tiles = m_pad // tm
    if m_pad != m_real:
        patches = jnp.pad(patches, ((0, m_pad - m_real), (0, 0)))

    kern1 = functools.partial(_matmul_stats_kernel, block_rows=tm, m_real=m_real)
    y_full, stats = pl.pallas_call(
        kern1,
        out_shape=(jax.ShapeDtypeStruct((m_pad, cpad), jnp.float32),
                   jax.ShapeDtypeStruct((num_tiles * 8, cpad), jnp.float32)),
        grid=(num_tiles,),
        in_specs=[pl.BlockSpec((tm, kdim), lambda i: (i, 0)),
                  pl.BlockSpec((kdim, cpad), lambda i: (0, 0))],
        out_specs=(pl.BlockSpec((tm, cpad), lambda i: (i, 0)),
                   pl.BlockSpec((8, cpad), lambda i: (i, 0))),
        compiler_params=_CPARAMS,
    )(patches, wmat)

    # Reduce per-tile partial sums -> folded per-channel scale/shift (tiny, f32).
    st = stats.reshape(num_tiles, 8, cpad)
    colsum = jnp.sum(st[:, 0, :], axis=0)
    colsumsq = jnp.sum(st[:, 1, :], axis=0)
    inv_m = 1.0 / float(m_real)
    mean = colsum * inv_m
    var = jnp.maximum(colsumsq * inv_m - mean * mean, 0.0)   # f32; guarded vs cancellation
    scale = gamma_pad * jax.lax.rsqrt(var + EPS)
    shift = beta_pad - mean * scale

    out_full = pl.pallas_call(
        _scale_shift_lrelu_kernel,
        out_shape=jax.ShapeDtypeStruct((m_pad, cpad), jnp.float32),
        grid=(num_tiles,),
        in_specs=[pl.BlockSpec((tm, cpad), lambda i: (i, 0)),
                  pl.BlockSpec((1, cpad), lambda i: (0, 0)),
                  pl.BlockSpec((1, cpad), lambda i: (0, 0))],
        out_specs=pl.BlockSpec((tm, cpad), lambda i: (i, 0)),
        compiler_params=_CPARAMS,
    )(y_full, scale.reshape(1, cpad), shift.reshape(1, cpad))

    return out_full[:m_real, :cout].reshape(N, ho, wo, cout)


# ---------------------------------------------------------------------------
# Parameter preparation (hoisted out of the hot path) and forward
# ---------------------------------------------------------------------------
def prepare_params(raw):
    """Reorder / lane-pad / cast weights once, outside the jitted forward."""
    def prep_w(w):                       # (Cout, Cin, kh, kw) -> (kh*kw*Cin, Cpad) bf16
        cout = w.shape[0]
        cpad = _round_up(cout, LANES)
        wm = jnp.transpose(w, (2, 3, 1, 0)).reshape(-1, cout)
        wm = jnp.pad(wm, ((0, 0), (0, cpad - cout)))
        return wm.astype(jnp.bfloat16)

    def prep_vec(v):                     # (Cout,) -> (Cpad,) f32, zero-padded
        cpad = _round_up(v.shape[0], LANES)
        return jnp.pad(v.astype(jnp.float32), (0, cpad - v.shape[0]))

    # Note: conv biases b1/b2 cancel inside train-mode BatchNorm and are unused.
    return dict(
        w1=prep_w(raw["w1"]), g1=prep_vec(raw["g1"]), beta1=prep_vec(raw["beta1"]),
        w2=prep_w(raw["w2"]), g2=prep_vec(raw["g2"]), beta2=prep_vec(raw["beta2"]),
    )


@functools.partial(jax.jit, static_argnames=("c1", "c2"))
def source_encode_residual_block(x_nchw, params, *, c1, c2):
    # layout: input/output NCHW (PyTorch convention); internal compute NHWC
    # (channels on the 128-lane axis).
    x = jnp.transpose(x_nchw, (0, 2, 3, 1))
    h1 = _conv_bn_lrelu_stage(x, params["w1"], params["g1"], params["beta1"],
                              cout=c1, k=3, stride=2, pad=0)
    h2 = _conv_bn_lrelu_stage(h1, params["w2"], params["g2"], params["beta2"],
                              cout=c2, k=3, stride=2, pad=1)
    encode_x = jnp.transpose(h2, (0, 3, 1, 2))
    return x_nchw, encode_x


# ---------------------------------------------------------------------------
# Pure-JAX f32 reference (PyTorch semantics) for a correctness sanity check.
# ---------------------------------------------------------------------------
def _reference(x_nchw, p):
    def stage(x, w, b, g, beta, stride, pad):
        y = jax.lax.conv_general_dilated(
            x, w, window_strides=(stride, stride),
            padding=[(pad, pad), (pad, pad)],
            dimension_numbers=("NCHW", "OIHW", "NCHW"))
        y = y + b[None, :, None, None]
        mean = jnp.mean(y, axis=(0, 2, 3), keepdims=True)
        var = jnp.mean((y - mean) ** 2, axis=(0, 2, 3), keepdims=True)
        z = (g[None, :, None, None] * (y - mean) * jax.lax.rsqrt(var + EPS)
             + beta[None, :, None, None])
        return jnp.where(z >= 0, z, NEG_SLOPE * z)

    h = stage(x_nchw, p["w1"], p["b1"], p["g1"], p["beta1"], 2, 0)
    h = stage(h, p["w2"], p["b2"], p["g2"], p["beta2"], 2, 1)
    return h


if __name__ == "__main__":
    key = jax.random.PRNGKey(0)
    in_features = 4               # small, consistent with the module structure
    N, H, W = 2, 16, 16
    c1, c2 = 4 * in_features, 8 * in_features

    k0, k1, k2, k3, k4 = jax.random.split(key, 5)
    x = jax.random.normal(k0, (N, in_features, H, W), jnp.float32)

    fan1 = float(in_features * 9)
    fan2 = float(c1 * 9)
    raw_params = dict(
        w1=jax.random.normal(k1, (c1, in_features, 3, 3), jnp.float32) / jnp.sqrt(fan1),
        b1=jax.random.normal(k2, (c1,), jnp.float32) * 0.01,
        g1=jnp.ones((c1,), jnp.float32),
        beta1=jnp.zeros((c1,), jnp.float32),
        w2=jax.random.normal(k3, (c2, c1, 3, 3), jnp.float32) / jnp.sqrt(fan2),
        b2=jax.random.normal(k4, (c2,), jnp.float32) * 0.01,
        g2=jnp.ones((c2,), jnp.float32),
        beta2=jnp.zeros((c2,), jnp.float32),
    )

    prepared = prepare_params(raw_params)
    x_out, encode_x = source_encode_residual_block(x, prepared, c1=c1, c2=c2)
    jax.block_until_ready((x_out, encode_x))

    # Shape checks: conv1 (p0,s2): 16 -> 7 ; conv2 (p1,s2): 7 -> 4
    assert x_out.shape == (N, in_features, H, W)
    assert encode_x.shape == (N, c2, 4, 4)
    assert bool(jnp.all(jnp.isfinite(encode_x)))

    # Numerical sanity check against an f32 reference (bf16 matmul tolerance).
    ref = _reference(x, raw_params)
    max_err = float(jnp.max(jnp.abs(encode_x - ref)))
    assert max_err < 0.3, f"max abs err vs f32 reference: {max_err}"

    print("KERNEL_OK")
</pallas_src>

<mosaic_0001>
module attributes {stable_mosaic.version = 11 : i64} {
  func.func @_matmul_stats_kernel(%arg0: i32, %arg1: memref<104x36xbf16, #tpu.memory_space<vmem>>, %arg2: memref<36x128xbf16, #tpu.memory_space<vmem>>, %arg3: memref<104x128xf32, #tpu.memory_space<vmem>>, %arg4: memref<8x128xf32, #tpu.memory_space<vmem>>) attributes {dimension_semantics = [#tpu.dimension_semantics<parallel>], iteration_bounds = array<i64: 1>, scalar_prefetch = 0 : i64, scratch_operands = 0 : i64, tpu.core_type = #tpu.core_type<tc>, window_params = [{transform_indices = @transform_0, window_bounds = array<i64: 104, 36>}, {pipeline_mode = #tpu.pipeline_mode<synchronous>, transform_indices = @transform_1, window_bounds = array<i64: 36, 128>}, {transform_indices = @transform_2, window_bounds = array<i64: 104, 128>}, {transform_indices = @transform_3, window_bounds = array<i64: 8, 128>}]} {
    %c0 = arith.constant 0 : index
    %c0_0 = arith.constant 0 : index
    %0 = vector.load %arg1[%c0, %c0_0] : memref<104x36xbf16, #tpu.memory_space<vmem>>, vector<104x36xbf16>
    %c0_1 = arith.constant 0 : index
    %c0_2 = arith.constant 0 : index
    %1 = vector.load %arg2[%c0_1, %c0_2] : memref<36x128xbf16, #tpu.memory_space<vmem>>, vector<36x128xbf16>
    %cst = arith.constant dense<0.000000e+00> : vector<104x128xf32>
    %2 = tpu.matmul %0, %1, %cst {dimension_numbers = #tpu.dot_dimension_numbers<[1], [0], [0], [1], [0, 0, 1, 1], [], []>} : vector<104x36xbf16>, vector<36x128xbf16>, vector<104x128xf32> -> vector<104x128xf32>
    %c0_3 = arith.constant 0 : index
    %c0_4 = arith.constant 0 : index
    %3 = vector.load %arg3[%c0_3, %c0_4] : memref<104x128xf32, #tpu.memory_space<vmem>>, vector<104x128xf32>
    tpu.vector_store %arg3[%c0_3, %c0_4], %2 {strides = array<i32>} : memref<104x128xf32, #tpu.memory_space<vmem>>, vector<104x128xf32>,
    %c104_i32 = arith.constant 104 : i32
    %4 = arith.muli %arg0, %c104_i32 : i32
    %5 = tpu.iota {dimensions = array<i32: 0>} : vector<104x1xi32>
    %6 = vector.broadcast %4 : i32 to vector<104x1xi32>
    %7 = arith.addi %6, %5 : vector<104x1xi32>
    %c98_i32 = arith.constant 98 : i32
    %8 = vector.broadcast %c98_i32 : i32 to vector<104x1xi32>
    %9 = arith.cmpi slt, %7, %8 : vector<104x1xi32>
    %cst_5 = arith.constant 0.000000e+00 : f32
    %10 = vector.shape_cast %9 : vector<104x1xi1> to vector<104x1xi1>
    %11 = vector.broadcast %10 : vector<104x1xi1> to vector<104x128xi1>
    %12 = vector.broadcast %cst_5 : f32 to vector<104x128xf32>
    %13 = arith.select %11, %2, %12 : vector<104x128xi1>, vector<104x128xf32>
    %cst_6 = arith.constant dense<0.000000e+00> : vector<128xf32>
    %14 = vector.multi_reduction <add>, %13, %cst_6 [0] : vector<104x128xf32> to vector<128xf32>
    %15 = vector.shape_cast %14 : vector<128xf32> to vector<1x128xf32>
    %16 = arith.mulf %13, %13 : vector<104x128xf32>
    %cst_7 = arith.constant dense<0.000000e+00> : vector<128xf32>
    %17 = vector.multi_reduction <add>, %16, %cst_7 [0] : vector<104x128xf32> to vector<128xf32>
    %18 = vector.shape_cast %17 : vector<128xf32> to vector<1x128xf32>
    %cst_8 = arith.constant 0.000000e+00 : f32
    %19 = vector.broadcast %cst_8 : f32 to vector<6x128xf32>
    %20 = tpu.concatenate %15, %18, %19 in 0 : vector<1x128xf32>, vector<1x128xf32>, vector<6x128xf32> -> vector<8x128xf32>
    %c0_9 = arith.constant 0 : index
    %c0_10 = arith.constant 0 : index
    %21 = vector.load %arg4[%c0_9, %c0_10] : memref<8x128xf32, #tpu.memory_space<vmem>>, vector<8x128xf32>
    tpu.vector_store %arg4[%c0_9, %c0_10], %20 {strides = array<i32>} : memref<8x128xf32, #tpu.memory_space<vmem>>, vector<8x128xf32>,
    return
  }
  func.func @transform_0(%arg0: i32) -> (i32, i32) {
    %c0_i32 = arith.constant 0 : i32
    %c0_i32_0 = arith.constant 0 : i32
    return %arg0, %c0_i32 : i32, i32
  }
  func.func @transform_1(%arg0: i32) -> (i32, i32) {
    %c0_i32 = arith.constant 0 : i32
    %c0_i32_0 = arith.constant 0 : i32
    %c0_i32_1 = arith.constant 0 : i32
    return %c0_i32, %c0_i32_0 : i32, i32
  }
  func.func @transform_2(%arg0: i32) -> (i32, i32) {
    %c0_i32 = arith.constant 0 : i32
    %c0_i32_0 = arith.constant 0 : i32
    return %arg0, %c0_i32 : i32, i32
  }
  func.func @transform_3(%arg0: i32) -> (i32, i32) {
    %c0_i32 = arith.constant 0 : i32
    %c0_i32_0 = arith.constant 0 : i32
    return %arg0, %c0_i32 : i32, i32
  }
}

module attributes {stable_mosaic.version = 11 : i64} {
  func.func @_scale_shift_lrelu_kernel(%arg0: i32, %arg1: memref<104x128xf32, #tpu.memory_space<vmem>>, %arg2: memref<1x128xf32, #tpu.memory_space<vmem>>, %arg3: memref<1x128xf32, #tpu.memory_space<vmem>>, %arg4: memref<104x128xf32, #tpu.memory_space<vmem>>) attributes {dimension_semantics = [#tpu.dimension_semantics<parallel>], iteration_bounds = array<i64: 1>, scalar_prefetch = 0 : i64, scratch_operands = 0 : i64, tpu.core_type = #tpu.core_type<tc>, window_params = [{transform_indices = @transform_0, window_bounds = array<i64: 104, 128>}, {pipeline_mode = #tpu.pipeline_mode<synchronous>, transform_indices = @transform_1, window_bounds = array<i64: 1, 128>}, {pipeline_mode = #tpu.pipeline_mode<synchronous>, transform_indices = @transform_2, window_bounds = array<i64: 1, 128>}, {transform_indices = @transform_3, window_bounds = array<i64: 104, 128>}]} {
    %c0 = arith.constant 0 : index
    %c0_0 = arith.constant 0 : index
    %0 = vector.load %arg1[%c0, %c0_0] : memref<104x128xf32, #tpu.memory_space<vmem>>, vector<104x128xf32>
    %c0_1 = arith.constant 0 : index
    %c0_2 = arith.constant 0 : index
    %1 = vector.load %arg2[%c0_1, %c0_2] : memref<1x128xf32, #tpu.memory_space<vmem>>, vector<1x128xf32>
    %2 = vector.broadcast %1 : vector<1x128xf32> to vector<104x128xf32>
    %3 = arith.mulf %0, %2 : vector<104x128xf32>
    %c0_3 = arith.constant 0 : index
    %c0_4 = arith.constant 0 : index
    %4 = vector.load %arg3[%c0_3, %c0_4] : memref<1x128xf32, #tpu.memory_space<vmem>>, vector<1x128xf32>
    %5 = vector.broadcast %4 : vector<1x128xf32> to vector<104x128xf32>
    %6 = arith.addf %3, %5 : vector<104x128xf32>
    %cst = arith.constant 0.000000e+00 : f32
    %7 = vector.broadcast %cst : f32 to vector<104x128xf32>
    %8 = arith.cmpf oge, %6, %7 : vector<104x128xf32>
    %cst_5 = arith.constant 0.00999999977 : f32
    %9 = vector.broadcast %cst_5 : f32 to vector<104x128xf32>
    %10 = arith.mulf %9, %6 : vector<104x128xf32>
    %11 = arith.select %8, %6, %10 : vector<104x128xi1>, vector<104x128xf32>
    %c0_6 = arith.constant 0 : index
    %c0_7 = arith.constant 0 : index
    %12 = vector.load %arg4[%c0_6, %c0_7] : memref<104x128xf32, #tpu.memory_space<vmem>>, vector<104x128xf32>
    tpu.vector_store %arg4[%c0_6, %c0_7], %11 {strides = array<i32>} : memref<104x128xf32, #tpu.memory_space<vmem>>, vector<104x128xf32>,
    return
  }
  func.func @transform_0(%arg0: i32) -> (i32, i32) {
    %c0_i32 = arith.constant 0 : i32
    %c0_i32_0 = arith.constant 0 : i32
    return %arg0, %c0_i32 : i32, i32
  }
  func.func @transform_1(%arg0: i32) -> (i32, i32) {
    %c0_i32 = arith.constant 0 : i32
    %c0_i32_0 = arith.constant 0 : i32
    %c0_i32_1 = arith.constant 0 : i32
    return %c0_i32, %c0_i32_0 : i32, i32
  }
  func.func @transform_2(%arg0: i32) -> (i32, i32) {
    %c0_i32 = arith.constant 0 : i32
    %c0_i32_0 = arith.constant 0 : i32
    %c0_i32_1 = arith.constant 0 : i32
    return %c0_i32, %c0_i32_0 : i32, i32
  }
  func.func @transform_3(%arg0: i32) -> (i32, i32) {
    %c0_i32 = arith.constant 0 : i32
    %c0_i32_0 = arith.constant 0 : i32
    return %arg0, %c0_i32 : i32, i32
  }
}

module attributes {stable_mosaic.version = 11 : i64} {
  func.func @_matmul_stats_kernel(%arg0: i32, %arg1: memref<32x144xbf16, #tpu.memory_space<vmem>>, %arg2: memref<144x128xbf16, #tpu.memory_space<vmem>>, %arg3: memref<32x128xf32, #tpu.memory_space<vmem>>, %arg4: memref<8x128xf32, #tpu.memory_space<vmem>>) attributes {dimension_semantics = [#tpu.dimension_semantics<parallel>], iteration_bounds = array<i64: 1>, scalar_prefetch = 0 : i64, scratch_operands = 0 : i64, tpu.core_type = #tpu.core_type<tc>, window_params = [{transform_indices = @transform_0, window_bounds = array<i64: 32, 144>}, {pipeline_mode = #tpu.pipeline_mode<synchronous>, transform_indices = @transform_1, window_bounds = array<i64: 144, 128>}, {transform_indices = @transform_2, window_bounds = array<i64: 32, 128>}, {transform_indices = @transform_3, window_bounds = array<i64: 8, 128>}]} {
    %c0 = arith.constant 0 : index
    %c0_0 = arith.constant 0 : index
    %0 = vector.load %arg1[%c0, %c0_0] : memref<32x144xbf16, #tpu.memory_space<vmem>>, vector<32x144xbf16>
    %c0_1 = arith.constant 0 : index
    %c0_2 = arith.constant 0 : index
    %1 = vector.load %arg2[%c0_1, %c0_2] : memref<144x128xbf16, #tpu.memory_space<vmem>>, vector<144x128xbf16>
    %cst = arith.constant dense<0.000000e+00> : vector<32x128xf32>
    %2 = tpu.matmul %0, %1, %cst {dimension_numbers = #tpu.dot_dimension_numbers<[1], [0], [0], [1], [0, 0, 1, 1], [], []>} : vector<32x144xbf16>, vector<144x128xbf16>, vector<32x128xf32> -> vector<32x128xf32>
    %c0_3 = arith.constant 0 : index
    %c0_4 = arith.constant 0 : index
    %3 = vector.load %arg3[%c0_3, %c0_4] : memref<32x128xf32, #tpu.memory_space<vmem>>, vector<32x128xf32>
    tpu.vector_store %arg3[%c0_3, %c0_4], %2 {strides = array<i32>} : memref<32x128xf32, #tpu.memory_space<vmem>>, vector<32x128xf32>,
    %c32_i32 = arith.constant 32 : i32
    %4 = arith.muli %arg0, %c32_i32 : i32
    %5 = tpu.iota {dimensions = array<i32: 0>} : vector<32x1xi32>
    %6 = vector.broadcast %4 : i32 to vector<32x1xi32>
    %7 = arith.addi %6, %5 : vector<32x1xi32>
    %c32_i32_5 = arith.constant 32 : i32
    %8 = vector.broadcast %c32_i32_5 : i32 to vector<32x1xi32>
    %9 = arith.cmpi slt, %7, %8 : vector<32x1xi32>
    %cst_6 = arith.constant 0.000000e+00 : f32
    %10 = vector.shape_cast %9 : vector<32x1xi1> to vector<32x1xi1>
    %11 = vector.broadcast %10 : vector<32x1xi1> to vector<32x128xi1>
    %12 = vector.broadcast %cst_6 : f32 to vector<32x128xf32>
    %13 = arith.select %11, %2, %12 : vector<32x128xi1>, vector<32x128xf32>
    %cst_7 = arith.constant dense<0.000000e+00> : vector<128xf32>
    %14 = vector.multi_reduction <add>, %13, %cst_7 [0] : vector<32x128xf32> to vector<128xf32>
    %15 = vector.shape_cast %14 : vector<128xf32> to vector<1x128xf32>
    %16 = arith.mulf %13, %13 : vector<32x128xf32>
    %cst_8 = arith.constant dense<0.000000e+00> : vector<128xf32>
    %17 = vector.multi_reduction <add>, %16, %cst_8 [0] : vector<32x128xf32> to vector<128xf32>
    %18 = vector.shape_cast %17 : vector<128xf32> to vector<1x128xf32>
    %cst_9 = arith.constant 0.000000e+00 : f32
    %19 = vector.broadcast %cst_9 : f32 to vector<6x128xf32>
    %20 = tpu.concatenate %15, %18, %19 in 0 : vector<1x128xf32>, vector<1x128xf32>, vector<6x128xf32> -> vector<8x128xf32>
    %c0_10 = arith.constant 0 : index
    %c0_11 = arith.constant 0 : index
    %21 = vector.load %arg4[%c0_10, %c0_11] : memref<8x128xf32, #tpu.memory_space<vmem>>, vector<8x128xf32>
    tpu.vector_store %arg4[%c0_10, %c0_11], %20 {strides = array<i32>} : memref<8x128xf32, #tpu.memory_space<vmem>>, vector<8x128xf32>,
    return
  }
  func.func @transform_0(%arg0: i32) -> (i32, i32) {
    %c0_i32 = arith.constant 0 : i32
    %c0_i32_0 = arith.constant 0 : i32
    return %arg0, %c0_i32 : i32, i32
  }
  func.func @transform_1(%arg0: i32) -> (i32, i32) {
    %c0_i32 = arith.constant 0 : i32
    %c0_i32_0 = arith.constant 0 : i32
    %c0_i32_1 = arith.constant 0 : i32
    return %c0_i32, %c0_i32_0 : i32, i32
  }
  func.func @transform_2(%arg0: i32) -> (i32, i32) {
    %c0_i32 = arith.constant 0 : i32
    %c0_i32_0 = arith.constant 0 : i32
    return %arg0, %c0_i32 : i32, i32
  }
  func.func @transform_3(%arg0: i32) -> (i32, i32) {
    %c0_i32 = arith.constant 0 : i32
    %c0_i32_0 = arith.constant 0 : i32
    return %arg0, %c0_i32 : i32, i32
  }
}

module attributes {stable_mosaic.version = 11 : i64} {
  func.func @_scale_shift_lrelu_kernel(%arg0: i32, %arg1: memref<32x128xf32, #tpu.memory_space<vmem>>, %arg2: memref<1x128xf32, #tpu.memory_space<vmem>>, %arg3: memref<1x128xf32, #tpu.memory_space<vmem>>, %arg4: memref<32x128xf32, #tpu.memory_space<vmem>>) attributes {dimension_semantics = [#tpu.dimension_semantics<parallel>], iteration_bounds = array<i64: 1>, scalar_prefetch = 0 : i64, scratch_operands = 0 : i64, tpu.core_type = #tpu.core_type<tc>, window_params = [{transform_indices = @transform_0, window_bounds = array<i64: 32, 128>}, {pipeline_mode = #tpu.pipeline_mode<synchronous>, transform_indices = @transform_1, window_bounds = array<i64: 1, 128>}, {pipeline_mode = #tpu.pipeline_mode<synchronous>, transform_indices = @transform_2, window_bounds = array<i64: 1, 128>}, {transform_indices = @transform_3, window_bounds = array<i64: 32, 128>}]} {
    %c0 = arith.constant 0 : index
    %c0_0 = arith.constant 0 : index
    %0 = vector.load %arg1[%c0, %c0_0] : memref<32x128xf32, #tpu.memory_space<vmem>>, vector<32x128xf32>
    %c0_1 = arith.constant 0 : index
    %c0_2 = arith.constant 0 : index
    %1 = vector.load %arg2[%c0_1, %c0_2] : memref<1x128xf32, #tpu.memory_space<vmem>>, vector<1x128xf32>
    %2 = vector.broadcast %1 : vector<1x128xf32> to vector<32x128xf32>
    %3 = arith.mulf %0, %2 : vector<32x128xf32>
    %c0_3 = arith.constant 0 : index
    %c0_4 = arith.constant 0 : index
    %4 = vector.load %arg3[%c0_3, %c0_4] : memref<1x128xf32, #tpu.memory_space<vmem>>, vector<1x128xf32>
    %5 = vector.broadcast %4 : vector<1x128xf32> to vector<32x128xf32>
    %6 = arith.addf %3, %5 : vector<32x128xf32>
    %cst = arith.constant 0.000000e+00 : f32
    %7 = vector.broadcast %cst : f32 to vector<32x128xf32>
    %8 = arith.cmpf oge, %6, %7 : vector<32x128xf32>
    %cst_5 = arith.constant 0.00999999977 : f32
    %9 = vector.broadcast %cst_5 : f32 to vector<32x128xf32>
    %10 = arith.mulf %9, %6 : vector<32x128xf32>
    %11 = arith.select %8, %6, %10 : vector<32x128xi1>, vector<32x128xf32>
    %c0_6 = arith.constant 0 : index
    %c0_7 = arith.constant 0 : index
    %12 = vector.load %arg4[%c0_6, %c0_7] : memref<32x128xf32, #tpu.memory_space<vmem>>, vector<32x128xf32>
    tpu.vector_store %arg4[%c0_6, %c0_7], %11 {strides = array<i32>} : memref<32x128xf32, #tpu.memory_space<vmem>>, vector<32x128xf32>,
    return
  }
  func.func @transform_0(%arg0: i32) -> (i32, i32) {
    %c0_i32 = arith.constant 0 : i32
    %c0_i32_0 = arith.constant 0 : i32
    return %arg0, %c0_i32 : i32, i32
  }
  func.func @transform_1(%arg0: i32) -> (i32, i32) {
    %c0_i32 = arith.constant 0 : i32
    %c0_i32_0 = arith.constant 0 : i32
    %c0_i32_1 = arith.constant 0 : i32
    return %c0_i32, %c0_i32_0 : i32, i32
  }
  func.func @transform_2(%arg0: i32) -> (i32, i32) {
    %c0_i32 = arith.constant 0 : i32
    %c0_i32_0 = arith.constant 0 : i32
    %c0_i32_1 = arith.constant 0 : i32
    return %c0_i32, %c0_i32_0 : i32, i32
  }
  func.func @transform_3(%arg0: i32) -> (i32, i32) {
    %c0_i32 = arith.constant 0 : i32
    %c0_i32_0 = arith.constant 0 : i32
    return %arg0, %c0_i32 : i32, i32
  }
}

</mosaic_0001>

<bundles_post_ra>
// kernel: source_encode_residual_block.5
= control target key start
LH: loop header
LB: loop body
LE: loop exit
PB: predicated region body
PF: predicated region fallthrough
CT: control target
= control target key end

     0   :  { %s259_s0 = inlined_call_operand.vmem [shape: f32[104,128], index: 0, kind: input, shape index: {}]   ;;  %s260_s1 = inlined_call_operand.vmem [shape: f32[1,128], index: 1, kind: input, shape index: {}]   ;;  %s261_s2 = inlined_call_operand.vmem [shape: f32[1,128], index: 2, kind: input, shape index: {}]   ;;  %s262_s3 = inlined_call_operand.vmem [shape: f32[104,128], index: 3, kind: output, shape index: {}]  }
   0x1   :  { %v14_v0 = vld [vmem:[%s259_s0] sm:$0xff]  ;;  %v15_v4 = vld [vmem:[%s259_s0 + $0x8] sm:$0xff]  ;;  %v16_v5 = vld [vmem:[%s259_s0 + $0x10] sm:$0xff] }
   0x2   :  { %v151_v1 = vld [vmem:[%s260_s1] ss:$0 sm:$0xff]  ;;  %v17_v6 = vld [vmem:[%s259_s0 + $0x18] sm:$0xff]  ;;  %v19_v11 = vld [vmem:[%s259_s0 + $0x28] sm:$0xff] }
   0x3   :  { %v156_v2 = vld [vmem:[%s261_s2] ss:$0 sm:$0xff]  ;;  %v34_v3 = vmul.f32 %v151_v1, %v14_v0  ;;  %v35_v7 = vmul.f32 %v151_v1, %v15_v4  ;;  %v36_v8 = vmul.f32 %v151_v1, %v16_v5  ;;  %v37_v9 = vmul.f32 %v151_v1, %v17_v6  ;;  %v20_v12 = vld [vmem:[%s259_s0 + $0x30] sm:$0xff]  ;;  %v21_v17 = vld [vmem:[%s259_s0 + $0x38] sm:$0xff] }
   0x4   :  { %v18_v10 = vld [vmem:[%s259_s0 + $0x20] sm:$0xff]  ;;  %v39_v15 = vmul.f32 %v151_v1, %v19_v11  ;;  %v40_v16 = vmul.f32 %v151_v1, %v20_v12  ;;  %v41_v21 = vmul.f32 %v151_v1, %v21_v17  ;;  %v23_v30 = vld [vmem:[%s259_s0 + $0x48] sm:$0xff]  ;;  %v24_v31 = vld [vmem:[%s259_s0 + $0x50] sm:$0xff] }
   0x5   :  { %v54_v13 = vadd.f32 %v156_v2, %v34_v3  ;;  %v38_v14 = vmul.f32 %v151_v1, %v18_v10  ;;  %v55_v18 = vadd.f32 %v156_v2, %v35_v7  ;;  %v56_v19 = vadd.f32 %v156_v2, %v36_v8  ;;  %v22_v25 = vld [vmem:[%s259_s0 + $0x40] sm:$0xff]  ;;  %v25_v43 = vld [vmem:[%s259_s0 + $0x58] sm:$0xff] }
   0x6   :  { %v57_v20 = vadd.f32 %v156_v2, %v37_v9  ;;  %v59_v24 = vadd.f32 %v156_v2, %v39_v15  ;;  %v60_v37 = vadd.f32 %v156_v2, %v40_v16  ;;  %v61_v38 = vadd.f32 %v156_v2, %v41_v21  ;;  %v26_v44 = vld [vmem:[%s259_s0 + $0x60] sm:$0xff] }
   0x7   :  { %vm67_vm0 = vcmp.ge.f32.partialorder %v54_v13, 0.0  ;;  %v80_v22 = vmul.f32 0.01, %v54_v13  ;;  %v58_v23 = vadd.f32 %v156_v2, %v38_v14  ;;  %vm68_vm1 = vcmp.ge.f32.partialorder %v55_v18, 0.0 }
   0x8   :  { %v81_v26 = vmul.f32 0.01, %v55_v18  ;;  %vm69_vm2 = vcmp.ge.f32.partialorder %v56_v19, 0.0  ;;  %v82_v27 = vmul.f32 0.01, %v56_v19  ;;  %vm70_vm3 = vcmp.ge.f32.partialorder %v57_v20, 0.0 }
   0x9   :  { %v93_v28 = vsel %vm67_vm0, %v54_v13, %v80_v22  ;;  %v83_v29 = vmul.f32 0.01, %v57_v20  ;;  %vm71_vm4 = vcmp.ge.f32.partialorder %v58_v23, 0.0  ;;  %v84_v34 = vmul.f32 0.01, %v58_v23 }
   0xa   :  { %106 = vst [vmem:[%s262_s3] sm:$0xff] %v93_v28  ;;  %v94_v32 = vsel %vm68_vm1, %v55_v18, %v81_v26  ;;  %v95_v33 = vsel %vm69_vm2, %v56_v19, %v82_v27  ;;  %vm72_vm5 = vcmp.ge.f32.partialorder %v59_v24, 0.0  ;;  %v85_v36 = vmul.f32 0.01, %v59_v24 }
   0xb   :  { %107 = vst [vmem:[%s262_s3 + $0x8] sm:$0xff] %v94_v32  ;;  %108 = vst [vmem:[%s262_s3 + $0x10] sm:$0xff] %v95_v33  ;;  %v96_v35 = vsel %vm70_vm3, %v57_v20, %v83_v29  ;;  %v97_v39 = vsel %vm71_vm4, %v58_v23, %v84_v34  ;;  %v42_v40 = vmul.f32 %v151_v1, %v22_v25  ;;  %vm73_vm6 = vcmp.ge.f32.partialorder %v60_v37, 0.0 }
   0xc   :  { %109 = vst [vmem:[%s262_s3 + $0x18] sm:$0xff] %v96_v35  ;;  %v43_v41 = vmul.f32 %v151_v1, %v23_v30  ;;  %v44_v42 = vmul.f32 %v151_v1, %v24_v31  ;;  %110 = vst [vmem:[%s262_s3 + $0x20] sm:$0xff] %v97_v39  ;;  %v98_v45 = vsel %vm72_vm5, %v59_v24, %v85_v36  ;;  %v86_v46 = vmul.f32 0.01, %v60_v37 }
   0xd   :  { %vm74_vm7 = vcmp.ge.f32.partialorder %v61_v38, 0.0  ;;  %111 = vst [vmem:[%s262_s3 + $0x28] sm:$0xff] %v98_v45  ;;  %v87_v47 = vmul.f32 0.01, %v61_v38  ;;  %v62_v48 = vadd.f32 %v156_v2, %v42_v40  ;;  %v45_v52 = vmul.f32 %v151_v1, %v25_v43 }
   0xe   :  { %v63_v49 = vadd.f32 %v156_v2, %v43_v41  ;;  %v64_v50 = vadd.f32 %v156_v2, %v44_v42  ;;  %v99_v51 = vsel %vm73_vm6, %v60_v37, %v86_v46  ;;  %v46_v53 = vmul.f32 %v151_v1, %v26_v44 }
   0xf   :  { %112 = vst [vmem:[%s262_s3 + $0x30] sm:$0xff] %v99_v51  ;;  %v100_v54 = vsel %vm74_vm7, %v61_v38, %v87_v47  ;;  %vm75_vm8 = vcmp.ge.f32.partialorder %v62_v48, 0.0  ;;  %v88_v55 = vmul.f32 0.01, %v62_v48  ;;  %v65_v58 = vadd.f32 %v156_v2, %v45_v52 }
  0x10   :  { %vm76_vm9 = vcmp.ge.f32.partialorder %v63_v49, 0.0  ;;  %113 = vst [vmem:[%s262_s3 + $0x38] sm:$0xff] %v100_v54  ;;  %v89_v56 = vmul.f32 0.01, %v63_v49  ;;  %vm77_vm10 = vcmp.ge.f32.partialorder %v64_v50, 0.0  ;;  %v66_v60 = vadd.f32 %v156_v2, %v46_v53 }
  0x11   :  { %v90_v57 = vmul.f32 0.01, %v64_v50  ;;  %v101_v59 = vsel %vm75_vm8, %v62_v48, %v88_v55  ;;  %vm78_vm11 = vcmp.ge.f32.partialorder %v65_v58, 0.0  ;;  %v91_v63 = vmul.f32 0.01, %v65_v58 }
  0x12   :  { %114 = vst [vmem:[%s262_s3 + $0x40] sm:$0xff] %v101_v59  ;;  %v102_v61 = vsel %vm76_vm9, %v63_v49, %v89_v56  ;;  %vm79_vm12 = vcmp.ge.f32.partialorder %v66_v60, 0.0  ;;  %v92_v0 = vmul.f32 0.01, %v66_v60 }
  0x13   :  { %v103_v62 = vsel %vm77_vm10, %v64_v50, %v90_v57  ;;  %115 = vst [vmem:[%s262_s3 + $0x48] sm:$0xff] %v102_v61  ;;  %v104_v1 = vsel %vm78_vm11, %v65_v58, %v91_v63 }
  0x14   :  { %116 = vst [vmem:[%s262_s3 + $0x50] sm:$0xff] %v103_v62  ;;  %117 = vst [vmem:[%s262_s3 + $0x58] sm:$0xff] %v104_v1  ;;  %v105_v2 = vsel %vm79_vm12, %v66_v60, %v92_v0 }
  0x15   :  { %118 = vst [vmem:[%s262_s3 + $0x60] sm:$0xff] %v105_v2 }

// kernel: source_encode_residual_block.4
= control target key start
LH: loop header
LB: loop body
LE: loop exit
PB: predicated region body
PF: predicated region fallthrough
CT: control target
= control target key end

     0   :  { %vm102_vm0 = vcmask 1041408   ;;  %v428_v0 = vmov 0.0   ;;  %vm429_vm1 = vmmov 0   ;;  %vm80_vm2 = vcmask 293888   ;;  %s550_s1 = inlined_call_operand.vmem [shape: bf16[36,128], index: 1, kind: input, shape index: {}]   ;;  %s551_s0 = inlined_call_operand.vmem [shape: bf16[104,36], index: 0, kind: input, shape index: {}]   ;;  %s552_s2 = inlined_call_operand.vmem [shape: f32[104,128], index: 2, kind: output, shape index: {0}]   ;;  %s553_s3 = inlined_call_operand.vmem [shape: f32[8,128], index: 3, kind: output, shape index: {1}]  }
   0x1   :  { %376 = vmatprep.subr.bf16.mxu0 %v428_v0  ;;  %v418_v1 = vld [vmem:[%s550_s1 + $0x10] ss:$0 sps:$4 sm:$0x33]   ;;  %382 = vmatprep.mubr.msk.bf16.mxu0 %vm429_vm1, %v428_v0  ;;  %v419_v3 = vld [vmem:[%s550_s1 + $0x8] sm:$0xff]   ;;  %v420_v4 = vld [vmem:[%s550_s1] sm:$0xff]   ;;  %v208_v39 = vlaneseq  ;;  %vm337_vm4 = vcmask 1040384  }
   0x2   :  { %410 = vmatprep.subr.bf16.mxu1 %v428_v0  ;;  %398 = vmatprep.mubr.msk.bf16.mxu1 %vm429_vm1, %v428_v0  ;;  %v104_v2 = vsel %vm102_vm0, %v418_v1, 0  ;;  %v421_v5 = vld [vmem:[%s551_s0] sm:$0xff]   ;;  %v422_v7 = vld [vmem:[%s551_s0 + $0x8] sm:$0xff]   ;;  %v424_v9 = vld [vmem:[%s551_s0 + $0x10] sm:$0xff]  }
   0x3   :  { %377 = vmatpush3.bf16.msra.mxu0 %v104_v2  ;;  %413 = vmatpush3.bf16.msra.mxu1 %v104_v2  ;;  %v423_v6 = vld [vmem:[%s551_s0 + $0x20] sm:$0xff]   ;;  %v425_v8 = vld [vmem:[%s551_s0 + $0x28] sm:$0xff]   ;;  %v427_v10 = vld [vmem:[%s551_s0 + $0x30] ss:$0 sps:$4 sm:$0xff]   ;;  %v209_v50 = vshrl.u32 %v208_v39, 7 }
   0x4   :  { %378 = vmatprep.subr.bf16.mxu0 %v428_v0  ;;  %411 = vmatprep.subr.bf16.mxu1 %v428_v0  ;;  %v426_v11 = vld [vmem:[%s551_s0 + $0x18] sm:$0xff]  }
   0x5   :  { %v221_v58 = vadd.s32 96, %v209_v50 }
   0x7   :  { %379 = vmatpush3.bf16.msra.mxu0 %v419_v3  ;;  %414 = vmatpush3.bf16.msra.mxu1 %v419_v3  ;;  %vm248_vm3 = vcmp.lt.s32.totalorder %v221_v58, 98 }
   0x8   :  { %380 = vmatprep.subr.bf16.mxu0 %v428_v0  ;;  %412 = vmatprep.subr.bf16.mxu1 %v428_v0 }
   0xb   :  { %381 = vmatpush3.bf16.msra.mxu0 %v420_v4  ;;  %415 = vmatpush3.bf16.msra.mxu1 %v420_v4 }
   0xe   :  { %383 = vmatmul.mubr.msk.bf16.vlgmr.msra.gmra.mxu0 %vm80_vm2, %v421_v5  ;;  %399 = vmatmul.mubr.msk.bf16.vlgmr.msra.gmra.mxu1 %vm80_vm2, %v423_v6 }
   0xf   :  { %386 = vmatprep.mubr.msk.bf16.mxu0 %vm429_vm1, %v428_v0  ;;  %402 = vmatprep.mubr.msk.bf16.mxu1 %vm429_vm1, %v428_v0 }
  0x16   :  { %387 = vmatmul.mubr.msk.bf16.gmra.mxu0 %vm80_vm2, %v422_v7  ;;  %403 = vmatmul.mubr.msk.bf16.gmra.mxu1 %vm80_vm2, %v425_v8 }
  0x17   :  { %390 = vmatprep.mubr.msk.bf16.mxu0 %vm429_vm1, %v428_v0  ;;  %406 = vmatprep.mubr.msk.bf16.mxu1 %vm429_vm1, %v428_v0 }
  0x1e   :  { %391 = vmatmul.mubr.msk.bf16.gmra.mxu0 %vm80_vm2, %v424_v9  ;;  %407 = vmatmul.mubr.msk.bf16.gmra.mxu1 %vm80_vm2, %v427_v10 }
  0x1f   :  { %394 = vmatprep.mubr.msk.bf16.mxu0 %vm429_vm1, %v428_v0 }
  0x26   :  { %395 = vmatmul.mubr.msk.bf16.gmra.mxu0 %vm80_vm2, %v426_v11 }
  0xce   :  { %v140_v12 = vpop.f32.mrf.mxu0  ;;  %v495_v13 = vpop.f32.mrf.mxu1 }
  0xcf   :  { %194 = vst [vmem:[%s552_s2] sm:$0xff] %v140_v12  ;;  %202 = vst [vmem:[%s552_s2 + $0x40] sm:$0xff] %v495_v13  ;;  %v306_v31 = vmul.f32 %v140_v12, %v140_v12  ;;  %v314_v0 = vmul.f32 %v495_v13, %v495_v13 }
  0xd0   :  { %v384_v14 = vpop.f32.mrf.mxu0  ;;  %v400_v15 = vpop.f32.mrf.mxu1 }
  0xd2   :  { %v143_v16 = vpop.f32.mrf.mxu0  ;;  %v504_v17 = vpop.f32.mrf.mxu1 }
  0xd3   :  { %195 = vst [vmem:[%s552_s2 + $0x8] sm:$0xff] %v143_v16  ;;  %203 = vst [vmem:[%s552_s2 + $0x48] sm:$0xff] %v504_v17  ;;  %v307_v28 = vmul.f32 %v143_v16, %v143_v16  ;;  %v288_v32 = vadd.f32 %v143_v16, %v140_v12  ;;  %v315_v3 = vmul.f32 %v504_v17, %v504_v17 }
  0xd4   :  { %v385_v18 = vpop.f32.mrf.mxu0  ;;  %v401_v19 = vpop.f32.mrf.mxu1 }
  0xd5   :  { %v319_v36 = vadd.f32 %v307_v28, %v306_v31 }
  0xd6   :  { %v148_v20 = vpop.f32.mrf.mxu0  ;;  %v180_v21 = vpop.f32.mrf.mxu1 }
  0xd7   :  { %196 = vst [vmem:[%s552_s2 + $0x10] sm:$0xff] %v148_v20  ;;  %204 = vst [vmem:[%s552_s2 + $0x50] sm:$0xff] %v180_v21  ;;  %v308_v33 = vmul.f32 %v148_v20, %v148_v20  ;;  %v289_v37 = vadd.f32 %v288_v32, %v148_v20  ;;  %v316_v7 = vmul.f32 %v180_v21, %v180_v21 }
  0xd8   :  { %v388_v22 = vpop.f32.mrf.mxu0  ;;  %v404_v23 = vpop.f32.mrf.mxu1 }
  0xd9   :  { %v320_v42 = vadd.f32 %v319_v36, %v308_v33 }
  0xda   :  { %v151_v24 = vpop.f32.mrf.mxu0  ;;  %v183_v25 = vpop.f32.mrf.mxu1 }
  0xdb   :  { %197 = vst [vmem:[%s552_s2 + $0x18] sm:$0xff] %v151_v24  ;;  %205 = vst [vmem:[%s552_s2 + $0x58] sm:$0xff] %v183_v25  ;;  %v309_v38 = vmul.f32 %v151_v24, %v151_v24  ;;  %v290_v43 = vadd.f32 %v289_v37, %v151_v24  ;;  %v317_v10 = vmul.f32 %v183_v25, %v183_v25 }
  0xdc   :  { %v389_v26 = vpop.f32.mrf.mxu0  ;;  %v405_v27 = vpop.f32.mrf.mxu1 }
  0xdd   :  { %v321_v47 = vadd.f32 %v320_v42, %v309_v38 }
  0xde   :  { %v156_v29 = vpop.f32.mrf.mxu0  ;;  %v188_v30 = vpop.f32.mrf.mxu1 }
  0xdf   :  { %198 = vst [vmem:[%s552_s2 + $0x20] sm:$0xff] %v156_v29  ;;  %206 = vst [vmem:[%s552_s2 + $0x60] sm:$0xff] %v188_v30  ;;  %v310_v44 = vmul.f32 %v156_v29, %v156_v29  ;;  %v291_v48 = vadd.f32 %v290_v43, %v156_v29  ;;  %v287_v6 = vsel %vm248_vm3, %v188_v30, 0.0 }
  0xe0   :  { %v392_v34 = vpop.f32.mrf.mxu0  ;;  %v408_v35 = vpop.f32.mrf.mxu1  ;;  %v318_v12 = vmul.f32 %v287_v6, %v287_v6 }
  0xe1   :  { %v322_v52 = vadd.f32 %v321_v47, %v310_v44 }
  0xe2   :  { %v159_v40 = vpop.f32.mrf.mxu0  ;;  %v191_v41 = vpop.f32.mrf.mxu1 }
  0xe3   :  { %199 = vst [vmem:[%s552_s2 + $0x28] sm:$0xff] %v159_v40  ;;  %v311_v49 = vmul.f32 %v159_v40, %v159_v40  ;;  %v292_v53 = vadd.f32 %v291_v48, %v159_v40 }
  0xe4   :  { %v393_v45 = vpop.f32.mrf.mxu0  ;;  %v409_v46 = vpop.f32.mrf.mxu1 }
  0xe5   :  { %v323_v56 = vadd.f32 %v322_v52, %v311_v49 }
  0xe6   :  { %v164_v51 = vpop.f32.mrf.mxu0 }
  0xe7   :  { %200 = vst [vmem:[%s552_s2 + $0x30] sm:$0xff] %v164_v51  ;;  %v312_v54 = vmul.f32 %v164_v51, %v164_v51  ;;  %v293_v57 = vadd.f32 %v292_v53, %v164_v51 }
  0xe8   :  { %v396_v55 = vpop.f32.mrf.mxu0 }
  0xe9   :  { %v324_v60 = vadd.f32 %v323_v56, %v312_v54 }
  0xea   :  { %v167_v59 = vpop.f32.mrf.mxu0 }
  0xeb   :  { %201 = vst [vmem:[%s552_s2 + $0x38] sm:$0xff] %v167_v59  ;;  %v294_v61 = vadd.f32 %v293_v57, %v167_v59  ;;  %v313_v62 = vmul.f32 %v167_v59, %v167_v59 }
  0xec   :  { %v397_v63 = vpop.f32.mrf.mxu0 }
  0xed   :  { %v295_v1 = vadd.f32 %v294_v61, %v495_v13  ;;  %v325_v2 = vadd.f32 %v324_v60, %v313_v62 }
  0xef   :  { %v296_v4 = vadd.f32 %v295_v1, %v504_v17  ;;  %v326_v5 = vadd.f32 %v325_v2, %v314_v0 }
  0xf1   :  { %v327_v8 = vadd.f32 %v326_v5, %v315_v3  ;;  %v297_v9 = vadd.f32 %v296_v4, %v180_v21 }
  0xf3   :  { %v298_v11 = vadd.f32 %v297_v9, %v183_v25  ;;  %v328_v14 = vadd.f32 %v327_v8, %v316_v7 }
  0xf5   :  { %v299_v15 = vadd.f32 %v298_v11, %v287_v6  ;;  %v329_v16 = vadd.f32 %v328_v14, %v317_v10 }
  0xf7   :  { %v300_v18 = vrot.slane %v299_v15, 4  ;;  %v330_v13 = vadd.f32 %v329_v16, %v318_v12 }
  0xf9   :  { %v301_v19 = vadd.f32 %v300_v18, %v299_v15  ;;  %v331_v20 = vrot.slane %v330_v13, 4 }
  0xfb   :  { %v302_v22 = vrot.slane %v301_v19, 2  ;;  %v332_v23 = vadd.f32 %v331_v20, %v330_v13 }
  0xfd   :  { %v303_v24 = vadd.f32 %v302_v22, %v301_v19  ;;  %v333_v26 = vrot.slane %v332_v23, 2 }
  0xff   :  { %v304_v17 = vrot.slane %v303_v24, 1  ;;  %v334_v27 = vadd.f32 %v333_v26, %v332_v23 }
 0x101   :  { %v335_v28 = vrot.slane %v334_v27, 1  ;;  %v305_v29 = vadd.f32 %v304_v17, %v303_v24 }
 0x103   :  { %v336_v21 = vadd.f32 %v335_v28, %v334_v27 }
 0x105   :  { %v338_v30 = vsel %vm337_vm4, %v305_v29, %v336_v21 }
 0x106   :  { %v339_v25 = vsel %vm102_vm0, %v338_v30, 0.0 }
 0x107   :  { %340 = vst [vmem:[%s553_s3] sm:$0xff] %v339_v25 }

// kernel: source_encode_residual_block.7
= control target key start
LH: loop header
LB: loop body
LE: loop exit
PB: predicated region body
PF: predicated region fallthrough
CT: control target
= control target key end

     0   :  { %s144_s0 = inlined_call_operand.vmem [shape: f32[32,128], index: 0, kind: input, shape index: {}]   ;;  %s145_s1 = inlined_call_operand.vmem [shape: f32[1,128], index: 1, kind: input, shape index: {}]   ;;  %s146_s2 = inlined_call_operand.vmem [shape: f32[1,128], index: 2, kind: input, shape index: {}]   ;;  %s147_s3 = inlined_call_operand.hbm [shape: f32[32,128], index: 3, kind: output, shape index: {}]  }
   0x1   :  { %v15_v0 = vld [vmem:[%s144_s0] sm:$0xff]  ;;  %v16_v4 = vld [vmem:[%s144_s0 + $0x8] sm:$0xff]  ;;  %v17_v5 = vld [vmem:[%s144_s0 + $0x10] sm:$0xff] }
   0x2   :  { %v73_v1 = vld [vmem:[%s145_s1] ss:$0 sm:$0xff]  ;;  %v18_v6 = vld [vmem:[%s144_s0 + $0x18] sm:$0xff] }
   0x3   :  { %v74_v2 = vld [vmem:[%s146_s2] ss:$0 sm:$0xff]  ;;  %v26_v3 = vmul.f32 %v73_v1, %v15_v0  ;;  %v27_v7 = vmul.f32 %v73_v1, %v16_v4  ;;  %v28_v8 = vmul.f32 %v73_v1, %v17_v5  ;;  %v29_v9 = vmul.f32 %v73_v1, %v18_v6 }
   0x4   :  { %8 = vsyncpa [#allocation3], 0  ;;  %s100_s1 = smov [#allocation2]  }
   0x5   :  { %v37_v10 = vadd.f32 %v74_v2, %v26_v3  ;;  %v38_v11 = vadd.f32 %v74_v2, %v27_v7  ;;  %v39_v12 = vadd.f32 %v74_v2, %v28_v8  ;;  %v40_v13 = vadd.f32 %v74_v2, %v29_v9  ;;  %s62_s2 = sshll.u32 %s100_s1, 4  ;;  %s63_s2 = int_to_ptr.vmem [resolvable:$true] %s62_s2 }
   0x6   :  { %s78_s0 = scalar_lea.vmem %s63_s2, 512  ;;  %p83_p1 = scmp.lt.s32.totalorder %s63_s2, %s63_s2 }
   0x7   :  { %vm41_vm0 = vcmp.ge.f32.partialorder %v37_v10, 0.0  ;;  %v45_v14 = vmul.f32 0.01, %v37_v10  ;;  %vm42_vm1 = vcmp.ge.f32.partialorder %v38_v11, 0.0  ;;  %v46_v15 = vmul.f32 0.01, %v38_v11  ;;  %p79_p0 = scmp.ne.s32.totalorder %s63_s2, %s78_s0  ;;  %p84_p2 = scmp.lt.s32.totalorder %s78_s0, %s78_s0 }
   0x8   :  { %vm43_vm2 = vcmp.ge.f32.partialorder %v39_v12, 0.0  ;;  %v47_v16 = vmul.f32 0.01, %v39_v12  ;;  %vm44_vm3 = vcmp.ge.f32.partialorder %v40_v13, 0.0  ;;  %v48_v18 = vmul.f32 0.01, %v40_v13 }
   0x9   :  { %v49_v17 = vsel %vm41_vm0, %v37_v10, %v45_v14  ;;  %v50_v19 = vsel %vm42_vm1, %v38_v11, %v46_v15  ;;  %p85_p3 = por %p84_p2, %p83_p1 }
   0xa   :  { %53 = vst [vmem:[#allocation2] sm:$0xff] %v49_v17  ;;  %v51_v20 = vsel %vm43_vm2, %v39_v12, %v47_v16  ;;  %54 = vst [vmem:[#allocation2 + $0x8] sm:$0xff] %v50_v19  ;;  %v52_v21 = vsel %vm44_vm3, %v40_v13, %v48_v18 }
   0xb   :  { %55 = vst [vmem:[#allocation2 + $0x10] sm:$0xff] %v51_v20  ;;  %56 = vst [vmem:[#allocation2 + $0x18] sm:$0xff] %v52_v21  ;;  %p86_p4 = pnand %p85_p3, %p79_p0 }
   0xd   :  { %89 = shalt.err (!%p86_p4)
}
   0xe   :  { %s101_s24 = smov 128   ;;  %s102_s25 = smov 8  }
   0xf   :  { %68 = dma.vmem_to_hbm [thread:$0]  %s63_s2, 512, %s147_s3, [#allocation3], %s101_s24, %s101_s24, %s102_s25  }
  0x10   :  { %98 = dma.done.wait [#allocation3], 512  }
  0x11   :  { %99 = vsyncadd [#allocation3], 4294966784 }
  0x12   :  { %72 = vsyncpa [#allocation3], 1 }

// kernel: source_encode_residual_block.6
= control target key start
LH: loop header
LB: loop body
LE: loop exit
PB: predicated region body
PF: predicated region fallthrough
CT: control target
= control target key end

     0   :  { %v279_v0 = vmov 0   ;;  %vm108_vm0 = vcmask 130048   ;;  %vm217_vm1 = vcmask 1040384   ;;  %vm219_vm2 = vcmask 1041408   ;;  %s354_s1 = inlined_call_operand.vmem [shape: bf16[144,128], index: 1, kind: input, shape index: {}]   ;;  %s355_s0 = inlined_call_operand.vmem [shape: bf16[32,144], index: 0, kind: input, shape index: {}]   ;;  %s356_s2 = inlined_call_operand.vmem [shape: f32[32,128], index: 2, kind: output, shape index: {0}]   ;;  %s357_s3 = inlined_call_operand.vmem [shape: f32[8,128], index: 3, kind: output, shape index: {1}]  }
   0x1   :  { %115 = vmatprep.subr.bf16.mxu0 %v279_v0  ;;  %245 = vmatprep.subr.bf16.mxu1 %v279_v0  ;;  %v264_v1 = vld [vmem:[%s354_s1 + $0x38] sm:$0xff]   ;;  %v265_v2 = vld [vmem:[%s354_s1 + $0x30] sm:$0xff]   ;;  %v266_v3 = vld [vmem:[%s354_s1 + $0x28] sm:$0xff]  }
   0x2   :  { %116 = vmatpush1.bf16.msra.mxu0 %v264_v1  ;;  %254 = vmatpush1.bf16.msra.mxu1 %v264_v1  ;;  %v267_v4 = vld [vmem:[%s354_s1 + $0x20] sm:$0xff]   ;;  %v278_v6 = vld [vmem:[%s355_s0 + $0x14] ss:$8 sps:$4 sm:$0xff]   ;;  %v270_v9 = vld [vmem:[%s354_s1 + $0x8] sm:$0xff]  }
   0x3   :  { %117 = vmatprep.subr.bf16.mxu0 %v279_v0  ;;  %246 = vmatprep.subr.bf16.mxu1 %v279_v0  ;;  %v275_v5 = vld [vmem:[%s355_s0 + $0x4] ss:$8 sps:$4 sm:$0xff]   ;;  %v268_v7 = vld [vmem:[%s354_s1 + $0x18] sm:$0xff]   ;;  %v269_v8 = vld [vmem:[%s354_s1 + $0x10] sm:$0xff]  }
   0x4   :  { %243 = vmatprep.mubr.msk.bf16.mxu0 %vm108_vm0, %v275_v5  ;;  %244 = vmatprep.mubr.msk.bf16.mxu1 %vm108_vm0, %v278_v6  ;;  %v271_v10 = vld [vmem:[%s354_s1] sm:$0xff]   ;;  %v276_v13 = vld [vmem:[%s355_s0 + $0x10] ss:$8 sps:$4 sm:$0xff]  }
   0x5   :  { %v272_v11 = vld [vmem:[%s354_s1 + $0x40] sm:$0xff]  }
   0x6   :  { %118 = vmatpush1.bf16.msra.mxu0 %v265_v2  ;;  %255 = vmatpush1.bf16.msra.mxu1 %v265_v2  ;;  %v273_v12 = vld [vmem:[%s355_s0] ss:$8 sps:$4 sm:$0xff]  }
   0x7   :  { %119 = vmatprep.subr.bf16.mxu0 %v279_v0  ;;  %247 = vmatprep.subr.bf16.mxu1 %v279_v0 }
   0xa   :  { %120 = vmatpush1.bf16.msra.mxu0 %v266_v3  ;;  %256 = vmatpush1.bf16.msra.mxu1 %v266_v3 }
   0xb   :  { %121 = vmatprep.subr.bf16.mxu0 %v279_v0  ;;  %248 = vmatprep.subr.bf16.mxu1 %v279_v0 }
   0xe   :  { %122 = vmatpush1.bf16.msra.mxu0 %v267_v4  ;;  %257 = vmatpush1.bf16.msra.mxu1 %v267_v4 }
   0xf   :  { %123 = vmatprep.subr.bf16.mxu0 %v279_v0  ;;  %249 = vmatprep.subr.bf16.mxu1 %v279_v0 }
  0x12   :  { %124 = vmatpush1.bf16.msra.mxu0 %v268_v7  ;;  %258 = vmatpush1.bf16.msra.mxu1 %v268_v7 }
  0x13   :  { %125 = vmatprep.subr.bf16.mxu0 %v279_v0  ;;  %250 = vmatprep.subr.bf16.mxu1 %v279_v0 }
  0x16   :  { %126 = vmatpush1.bf16.msra.mxu0 %v269_v8  ;;  %259 = vmatpush1.bf16.msra.mxu1 %v269_v8 }
  0x17   :  { %127 = vmatprep.subr.bf16.mxu0 %v279_v0  ;;  %251 = vmatprep.subr.bf16.mxu1 %v279_v0 }
  0x1a   :  { %128 = vmatpush1.bf16.msra.mxu0 %v270_v9  ;;  %260 = vmatpush1.bf16.msra.mxu1 %v270_v9 }
  0x1b   :  { %129 = vmatprep.subr.bf16.mxu0 %v279_v0  ;;  %252 = vmatprep.subr.bf16.mxu1 %v279_v0 }
  0x1e   :  { %130 = vmatpush1.bf16.msra.mxu0 %v271_v10  ;;  %261 = vmatpush1.bf16.msra.mxu1 %v271_v10 }
  0x1f   :  { %145 = vmatprep.subr.bf16.mxu0 %v279_v0  ;;  %253 = vmatprep.subr.bf16.mxu1 %v279_v0 }
  0x22   :  { %146 = vmatpush2.bf16.msra.mxu0 %v272_v11  ;;  %262 = vmatpush2.bf16.msra.mxu1 %v272_v11 }
  0x25   :  { %148 = vmatmul.mubr.bf16.vlgmr.msra.gmra.mxu0 %v273_v12  ;;  %156 = vmatmul.mubr.bf16.vlgmr.msra.gmra.mxu1 %v276_v13 }
  0xe5   :  { %v149_v14 = vpop.f32.mrf.mxu0  ;;  %v157_v15 = vpop.f32.mrf.mxu1 }
  0xe6   :  { %164 = vst [vmem:[%s356_s2] sm:$0xff] %v149_v14  ;;  %166 = vst [vmem:[%s356_s2 + $0x10] sm:$0xff] %v157_v15  ;;  %v204_v20 = vmul.f32 %v149_v14, %v149_v14  ;;  %v206_v25 = vmul.f32 %v157_v15, %v157_v15 }
  0xe7   :  { %v151_v16 = vpop.f32.mrf.mxu0  ;;  %v159_v17 = vpop.f32.mrf.mxu1 }
  0xe9   :  { %v152_v18 = vpop.f32.mrf.mxu0  ;;  %v160_v19 = vpop.f32.mrf.mxu1 }
  0xea   :  { %165 = vst [vmem:[%s356_s2 + $0x8] sm:$0xff] %v152_v18  ;;  %v195_v21 = vadd.f32 %v152_v18, %v149_v14  ;;  %v205_v22 = vmul.f32 %v152_v18, %v152_v18  ;;  %167 = vst [vmem:[%s356_s2 + $0x18] sm:$0xff] %v160_v19  ;;  %v207_v29 = vmul.f32 %v160_v19, %v160_v19 }
  0xeb   :  { %v154_v23 = vpop.f32.mrf.mxu0  ;;  %v162_v24 = vpop.f32.mrf.mxu1 }
  0xec   :  { %v208_v26 = vadd.f32 %v205_v22, %v204_v20  ;;  %v196_v27 = vadd.f32 %v195_v21, %v157_v15 }
  0xee   :  { %v197_v28 = vadd.f32 %v196_v27, %v160_v19  ;;  %v209_v30 = vadd.f32 %v208_v26, %v206_v25 }
  0xf0   :  { %v198_v31 = vrot.slane %v197_v28, 4  ;;  %v210_v32 = vadd.f32 %v209_v30, %v207_v29 }
  0xf2   :  { %v199_v33 = vadd.f32 %v198_v31, %v197_v28  ;;  %v211_v34 = vrot.slane %v210_v32, 4 }
  0xf4   :  { %v200_v35 = vrot.slane %v199_v33, 2  ;;  %v212_v36 = vadd.f32 %v211_v34, %v210_v32 }
  0xf6   :  { %v201_v37 = vadd.f32 %v200_v35, %v199_v33  ;;  %v213_v38 = vrot.slane %v212_v36, 2 }
  0xf8   :  { %v202_v39 = vrot.slane %v201_v37, 1  ;;  %v214_v40 = vadd.f32 %v213_v38, %v212_v36 }
  0xfa   :  { %v215_v41 = vrot.slane %v214_v40, 1  ;;  %v203_v42 = vadd.f32 %v202_v39, %v201_v37 }
  0xfc   :  { %v216_v43 = vadd.f32 %v215_v41, %v214_v40 }
  0xfe   :  { %v218_v44 = vsel %vm217_vm1, %v203_v42, %v216_v43 }
  0xff   :  { %v220_v45 = vsel %vm219_vm2, %v218_v44, 0.0 }
 0x100   :  { %221 = vst [vmem:[%s357_s3] sm:$0xff] %v220_v45 }

</bundles_post_ra>
